<compile_context>
chip_gen: v6e
topology: v6e:2x2x1
jax: 0.10.0
libtpu: 0.0.40
codegen_flags: <defaults>
</compile_context>

<pallas_src>
import jax
import jax.numpy as jnp
from jax.experimental import pallas as pl
from jax.experimental.pallas import tpu as pltpu

LANE = 128


def _round_up(x, m):
    return ((x + m - 1) // m) * m


def mlp_kernel(x_ref, w1_ref, b1_ref, w2_ref, b2_ref, w3_ref, b3_ref, o_ref):
    # Input tile is f32 in HBM/VMEM; cast to bf16 on the VPU (free under a
    # DMA/MXU-bound kernel) instead of an extra wrapper-side HBM pass.
    x = x_ref[...].astype(jnp.bfloat16)
    # Layer 1: Linear + ReLU (bf16 matmul, f32 accumulate)
    h1 = jnp.dot(x, w1_ref[...], preferred_element_type=jnp.float32)
    h1 = jnp.maximum(h1 + b1_ref[...], 0.0)
    # Layer 2: Linear + ReLU
    h2 = jnp.dot(h1.astype(jnp.bfloat16), w2_ref[...],
                 preferred_element_type=jnp.float32)
    h2 = jnp.maximum(h2 + b2_ref[...], 0.0)
    # Layer 3: Linear (logits, no activation) -- output width == num_classes
    out = jnp.dot(h2.astype(jnp.bfloat16), w3_ref[...],
                  preferred_element_type=jnp.float32)
    o_ref[...] = (out + b3_ref[...]).astype(o_ref.dtype)


def prepare_params(w1, b1, w2, b2, w3, b3):
    """Pad hidden dim to 128 lanes and cast matmul operands to bf16, ONCE.

    Weights are stored transposed vs. PyTorch: (in, out), so the kernel does
    plain `x @ W + b`.  Zero padding is exact through Linear+ReLU (padded
    columns and biases are zero, so padded hidden lanes stay exactly 0).
    The class dim of w3/b3 is NOT padded (see output-stream note above).
    """
    hid = w1.shape[1]
    hid_p = _round_up(hid, LANE)
    w1p = jnp.pad(w1, ((0, 0), (0, hid_p - hid))).astype(jnp.bfloat16)
    b1p = jnp.pad(b1, ((0, 0), (0, hid_p - hid))).astype(jnp.float32)
    w2p = jnp.pad(w2, ((0, hid_p - hid), (0, hid_p - hid))).astype(jnp.bfloat16)
    b2p = jnp.pad(b2, ((0, 0), (0, hid_p - hid))).astype(jnp.float32)
    w3p = jnp.pad(w3, ((0, hid_p - hid), (0, 0))).astype(jnp.bfloat16)
    b3p = b3.astype(jnp.float32)
    return (w1p, b1p, w2p, b2p, w3p, b3p)


def _choose_tile(batch, block_b, min_grid_steps):
    """Batch tile: multiple of 16, as large as block_b, but with >= min_grid_steps
    grid steps whenever the batch is big enough (v7x has 2 TensorCores)."""
    b_req = _round_up(batch, 16)
    tb = min(_round_up(block_b, 16), b_req)
    if b_req // tb < min_grid_steps and b_req >= min_grid_steps * 16:
        tb = _round_up(pl.cdiv(b_req, min_grid_steps), 16)
    b_pad = _round_up(batch, tb)
    return tb, b_pad


def _vmem_limit_bytes(tb, in_f, hid_p, ncls):
    """Budget VMEM from actual buffer sizes; cap for v7x's 64 MiB physical VMEM."""
    need = 0
    need += 2 * tb * in_f * 4                       # x block (f32, double-buffered)
    need += 2 * tb * ncls * 4                       # out block (f32, double-buffered)
    need += 2 * 2 * (in_f * hid_p + hid_p * hid_p + hid_p * ncls)   # bf16 weights x2
    need += 2 * 4 * (hid_p + hid_p + ncls)          # f32 biases x2
    need += 4 * tb * hid_p * 4                      # activation / compiler scratch headroom
    limit = max(32 * 1024 * 1024, int(need * 1.5))
    return min(limit, 56 * 1024 * 1024)


def neural_net_forward(x, prepared, *, block_b=2048, min_grid_steps=2):
    """x: f32 (B, in).  prepared: output of prepare_params.  Returns f32 (B, num_classes)."""
    w1p, b1p, w2p, b2p, w3p, b3p = prepared
    B, in_f = x.shape
    hid_p = w1p.shape[1]
    ncls = w3p.shape[1]

    tb, b_pad = _choose_tile(B, block_b, min_grid_steps)
    xp = x if b_pad == B else jnp.pad(x, ((0, b_pad - B), (0, 0)))

    grid = (b_pad // tb,)
    resident = lambda a: pl.BlockSpec(a.shape, lambda i: (0, 0))

    out_padded = pl.pallas_call(
        mlp_kernel,
        out_shape=jax.ShapeDtypeStruct((b_pad, ncls), jnp.float32),
        grid_spec=pltpu.PrefetchScalarGridSpec(
            num_scalar_prefetch=0,
            grid=grid,
            in_specs=[
                pl.BlockSpec((tb, in_f), lambda i: (i, 0)),  # x: batch-tiled
                resident(w1p), resident(b1p),                # weights/biases:
                resident(w2p), resident(b2p),                # loaded once,
                resident(w3p), resident(b3p),                # stay in VMEM
            ],
            out_specs=pl.BlockSpec((tb, ncls), lambda i: (i, 0)),
        ),
        compiler_params=pltpu.CompilerParams(
            dimension_semantics=("parallel",),   # shard batch grid across TCs on v7x
            vmem_limit_bytes=_vmem_limit_bytes(tb, in_f, hid_p, ncls),
        ),
    )(xp, w1p, b1p, w2p, b2p, w3p, b3p)

    return out_padded if b_pad == B else out_padded[:B]


def init_linear(key, fan_in, fan_out):
    # Mimic PyTorch nn.Linear default init: U(-1/sqrt(fan_in), 1/sqrt(fan_in))
    kw, kb = jax.random.split(key)
    bound = 1.0 / jnp.sqrt(fan_in)
    # stored as (in, out) == torch weight (out, in) transposed
    w = jax.random.uniform(kw, (fan_in, fan_out), jnp.float32, -bound, bound)
    b = jax.random.uniform(kb, (1, fan_out), jnp.float32, -bound, bound)
    return w, b


def _reference_f32(x, w1, b1, w2, b2, w3, b3):
    h = jnp.maximum(x @ w1 + b1, 0.0)
    h = jnp.maximum(h @ w2 + b2, 0.0)
    return h @ w3 + b3


def _reference_bf16(x, w1, b1, w2, b2, w3, b3):
    # Same quantization as the kernel: bf16 matmul operands, f32 accumulate.
    h = jnp.maximum(jnp.dot(x.astype(jnp.bfloat16), w1.astype(jnp.bfloat16),
                            preferred_element_type=jnp.float32) + b1, 0.0)
    h = jnp.maximum(jnp.dot(h.astype(jnp.bfloat16), w2.astype(jnp.bfloat16),
                            preferred_element_type=jnp.float32) + b2, 0.0)
    return jnp.dot(h.astype(jnp.bfloat16), w3.astype(jnp.bfloat16),
                   preferred_element_type=jnp.float32) + b3


if __name__ == "__main__":
    input_size, hidden_size, num_classes = 32, 64, 16

    key = jax.random.PRNGKey(0)
    kx, k1, k2, k3 = jax.random.split(key, 4)

    w1, b1 = init_linear(k1, input_size, hidden_size)
    w2, b2 = init_linear(k2, hidden_size, hidden_size)
    w3, b3 = init_linear(k3, hidden_size, num_classes)

    # Pad + cast params once (init time), reuse for every forward call.
    prepared = prepare_params(w1, b1, w2, b2, w3, b3)
    fwd = jax.jit(neural_net_forward)

    # batch=64 -> tile chooser picks tb=32, grid=(2,): both v7x TCs get work,
    # and no wrapper-side batch padding is needed.
    # batch=8  -> exercises the small / padded-batch (grid=1) path.
    for batch in (64, 8):
        x = jax.random.normal(kx, (batch, input_size), jnp.float32)
        out = fwd(x, prepared)
        jax.block_until_ready(out)
        assert out.shape == (batch, num_classes)

        # Loose check vs. pure-f32 PyTorch-equivalent reference.
        ref = _reference_f32(x, w1, b1, w2, b2, w3, b3)
        assert jnp.allclose(out, ref, atol=5e-2, rtol=5e-2), (
            f"batch={batch}: max abs err vs f32 ref = "
            f"{jnp.max(jnp.abs(out - ref))}")

        # Tight check vs. a reference with the kernel's exact bf16 quantization.
        ref_bf = _reference_bf16(x, w1, b1, w2, b2, w3, b3)
        assert jnp.allclose(out, ref_bf, atol=1e-3, rtol=1e-3), (
            f"batch={batch}: max abs err vs bf16 ref = "
            f"{jnp.max(jnp.abs(out - ref_bf))}")

    print("KERNEL_OK")
</pallas_src>

<mosaic_0001>
module attributes {stable_mosaic.version = 11 : i64} {
  func.func @mlp_kernel(%arg0: i32, %arg1: memref<32x32xf32, #tpu.memory_space<vmem>>, %arg2: memref<32x128xbf16, #tpu.memory_space<vmem>>, %arg3: memref<1x128xf32, #tpu.memory_space<vmem>>, %arg4: memref<128x128xbf16, #tpu.memory_space<vmem>>, %arg5: memref<1x128xf32, #tpu.memory_space<vmem>>, %arg6: memref<128x16xbf16, #tpu.memory_space<vmem>>, %arg7: memref<1x16xf32, #tpu.memory_space<vmem>>, %arg8: memref<32x16xf32, #tpu.memory_space<vmem>>) attributes {dimension_semantics = [#tpu.dimension_semantics<parallel>], iteration_bounds = array<i64: 2>, scalar_prefetch = 0 : i64, scratch_operands = 0 : i64, tpu.core_type = #tpu.core_type<tc>, window_params = [{transform_indices = @transform_0, window_bounds = array<i64: 32, 32>}, {pipeline_mode = #tpu.pipeline_mode<synchronous>, transform_indices = @transform_1, window_bounds = array<i64: 32, 128>}, {pipeline_mode = #tpu.pipeline_mode<synchronous>, transform_indices = @transform_2, window_bounds = array<i64: 1, 128>}, {pipeline_mode = #tpu.pipeline_mode<synchronous>, transform_indices = @transform_3, window_bounds = array<i64: 128, 128>}, {pipeline_mode = #tpu.pipeline_mode<synchronous>, transform_indices = @transform_4, window_bounds = array<i64: 1, 128>}, {pipeline_mode = #tpu.pipeline_mode<synchronous>, transform_indices = @transform_5, window_bounds = array<i64: 128, 16>}, {pipeline_mode = #tpu.pipeline_mode<synchronous>, transform_indices = @transform_6, window_bounds = array<i64: 1, 16>}, {transform_indices = @transform_7, window_bounds = array<i64: 32, 16>}]} {
    %c0 = arith.constant 0 : index
    %c0_0 = arith.constant 0 : index
    %0 = vector.load %arg1[%c0, %c0_0] : memref<32x32xf32, #tpu.memory_space<vmem>>, vector<32x32xf32>
    %1 = arith.truncf %0 : vector<32x32xf32> to vector<32x32xbf16>
    %c0_1 = arith.constant 0 : index
    %c0_2 = arith.constant 0 : index
    %2 = vector.load %arg2[%c0_1, %c0_2] : memref<32x128xbf16, #tpu.memory_space<vmem>>, vector<32x128xbf16>
    %cst = arith.constant dense<0.000000e+00> : vector<32x128xf32>
    %3 = tpu.matmul %1, %2, %cst {dimension_numbers = #tpu.dot_dimension_numbers<[1], [0], [0], [1], [0, 0, 1, 1], [], []>} : vector<32x32xbf16>, vector<32x128xbf16>, vector<32x128xf32> -> vector<32x128xf32>
    %c0_3 = arith.constant 0 : index
    %c0_4 = arith.constant 0 : index
    %4 = vector.load %arg3[%c0_3, %c0_4] : memref<1x128xf32, #tpu.memory_space<vmem>>, vector<1x128xf32>
    %5 = vector.broadcast %4 : vector<1x128xf32> to vector<32x128xf32>
    %6 = arith.addf %3, %5 : vector<32x128xf32>
    %cst_5 = arith.constant 0.000000e+00 : f32
    %7 = vector.broadcast %cst_5 : f32 to vector<32x128xf32>
    %8 = arith.maximumf %6, %7 : vector<32x128xf32>
    %9 = arith.truncf %8 : vector<32x128xf32> to vector<32x128xbf16>
    %c0_6 = arith.constant 0 : index
    %c0_7 = arith.constant 0 : index
    %10 = vector.load %arg4[%c0_6, %c0_7] : memref<128x128xbf16, #tpu.memory_space<vmem>>, vector<128x128xbf16>
    %cst_8 = arith.constant dense<0.000000e+00> : vector<32x128xf32>
    %11 = tpu.matmul %9, %10, %cst_8 {dimension_numbers = #tpu.dot_dimension_numbers<[1], [0], [0], [1], [0, 0, 1, 1], [], []>} : vector<32x128xbf16>, vector<128x128xbf16>, vector<32x128xf32> -> vector<32x128xf32>
    %c0_9 = arith.constant 0 : index
    %c0_10 = arith.constant 0 : index
    %12 = vector.load %arg5[%c0_9, %c0_10] : memref<1x128xf32, #tpu.memory_space<vmem>>, vector<1x128xf32>
    %13 = vector.broadcast %12 : vector<1x128xf32> to vector<32x128xf32>
    %14 = arith.addf %11, %13 : vector<32x128xf32>
    %cst_11 = arith.constant 0.000000e+00 : f32
    %15 = vector.broadcast %cst_11 : f32 to vector<32x128xf32>
    %16 = arith.maximumf %14, %15 : vector<32x128xf32>
    %17 = arith.truncf %16 : vector<32x128xf32> to vector<32x128xbf16>
    %c0_12 = arith.constant 0 : index
    %c0_13 = arith.constant 0 : index
    %18 = vector.load %arg6[%c0_12, %c0_13] : memref<128x16xbf16, #tpu.memory_space<vmem>>, vector<128x16xbf16>
    %cst_14 = arith.constant dense<0.000000e+00> : vector<32x16xf32>
    %19 = tpu.matmul %17, %18, %cst_14 {dimension_numbers = #tpu.dot_dimension_numbers<[1], [0], [0], [1], [0, 0, 1, 1], [], []>} : vector<32x128xbf16>, vector<128x16xbf16>, vector<32x16xf32> -> vector<32x16xf32>
    %c0_15 = arith.constant 0 : index
    %c0_16 = arith.constant 0 : index
    %20 = vector.load %arg7[%c0_15, %c0_16] : memref<1x16xf32, #tpu.memory_space<vmem>>, vector<1x16xf32>
    %21 = vector.broadcast %20 : vector<1x16xf32> to vector<32x16xf32>
    %22 = arith.addf %19, %21 : vector<32x16xf32>
    %c0_17 = arith.constant 0 : index
    %c0_18 = arith.constant 0 : index
    %23 = vector.load %arg8[%c0_17, %c0_18] : memref<32x16xf32, #tpu.memory_space<vmem>>, vector<32x16xf32>
    tpu.vector_store %arg8[%c0_17, %c0_18], %22 {strides = array<i32>} : memref<32x16xf32, #tpu.memory_space<vmem>>, vector<32x16xf32>,
    return
  }
  func.func @transform_0(%arg0: i32) -> (i32, i32) {
    %c0_i32 = arith.constant 0 : i32
    %c0_i32_0 = arith.constant 0 : i32
    return %arg0, %c0_i32 : i32, i32
  }
  func.func @transform_1(%arg0: i32) -> (i32, i32) {
    %c0_i32 = arith.constant 0 : i32
    %c0_i32_0 = arith.constant 0 : i32
    %c0_i32_1 = arith.constant 0 : i32
    return %c0_i32, %c0_i32_0 : i32, i32
  }
  func.func @transform_2(%arg0: i32) -> (i32, i32) {
    %c0_i32 = arith.constant 0 : i32
    %c0_i32_0 = arith.constant 0 : i32
    %c0_i32_1 = arith.constant 0 : i32
    return %c0_i32, %c0_i32_0 : i32, i32
  }
  func.func @transform_3(%arg0: i32) -> (i32, i32) {
    %c0_i32 = arith.constant 0 : i32
    %c0_i32_0 = arith.constant 0 : i32
    %c0_i32_1 = arith.constant 0 : i32
    return %c0_i32, %c0_i32_0 : i32, i32
  }
  func.func @transform_4(%arg0: i32) -> (i32, i32) {
    %c0_i32 = arith.constant 0 : i32
    %c0_i32_0 = arith.constant 0 : i32
    %c0_i32_1 = arith.constant 0 : i32
    return %c0_i32, %c0_i32_0 : i32, i32
  }
  func.func @transform_5(%arg0: i32) -> (i32, i32) {
    %c0_i32 = arith.constant 0 : i32
    %c0_i32_0 = arith.constant 0 : i32
    %c0_i32_1 = arith.constant 0 : i32
    return %c0_i32, %c0_i32_0 : i32, i32
  }
  func.func @transform_6(%arg0: i32) -> (i32, i32) {
    %c0_i32 = arith.constant 0 : i32
    %c0_i32_0 = arith.constant 0 : i32
    %c0_i32_1 = arith.constant 0 : i32
    return %c0_i32, %c0_i32_0 : i32, i32
  }
  func.func @transform_7(%arg0: i32) -> (i32, i32) {
    %c0_i32 = arith.constant 0 : i32
    %c0_i32_0 = arith.constant 0 : i32
    return %arg0, %c0_i32 : i32, i32
  }
}

</mosaic_0001>

<bundles_post_ra>
// kernel: neural_net_forward.1
= control target key start
LH: loop header
LB: loop body
LE: loop exit
PB: predicated region body
PF: predicated region fallthrough
CT: control target
= control target key end

     0   :  { %s861_s24 = smov 0   ;;  %s948_s0 = inlined_call_operand.vmem [shape: f32[64,32], index: 0, kind: input, shape index: {}]   ;;  %s949_s1 = inlined_call_operand.vmem [shape: bf16[32,128], index: 1, kind: input, shape index: {}]   ;;  %s950_s2 = inlined_call_operand.vmem [shape: f32[1,128], index: 2, kind: input, shape index: {}]   ;;  %s951_s3 = inlined_call_operand.vmem [shape: bf16[128,128], index: 3, kind: input, shape index: {}]   ;;  %s952_s4 = inlined_call_operand.vmem [shape: f32[1,128], index: 4, kind: input, shape index: {}]   ;;  %s953_s5 = inlined_call_operand.vmem [shape: bf16[128,16], index: 5, kind: input, shape index: {}]   ;;  %s954_s6 = inlined_call_operand.vmem [shape: f32[1,16], index: 6, kind: input, shape index: {}]   ;;  %s955_s7 = inlined_call_operand.vmem [shape: f32[64,16], index: 7, kind: output, shape index: {}]  }
   0x1 LB: > { %s681_s25 = sadd.s32 4294967295, %s819_s24   ;;  %p685_p0 = scmp.ge.s32.totalorder %s819_s24, 1  ;;  %s819_s24 = sphi %s861_s24, %s17_s24  }
   0x2   : > { %p238_p1 = scmp.lt.s32.totalorder %s819_s24, 3 }
   0x4   : > { %p239_p2 = pnand %p685_p0, %p238_p1 }
   0x5   : > { %s686_s28 = sshll.u32 (!%p239_p2), %s681_s25, 2 }
   0x6   : > { %242 = sbr.rel (%p239_p2) target bundleno = 634 (0x27a), region = 48  ;;  %p271_p3 = scmp.lt.s32.totalorder (!%p239_p2), %s686_s28, 7 }
   0xb   : > { %v795_v0 = vld [vmem:[%s949_s1 + $0x8] sm:$0xff]   ;;  %v796_v1 = vld [vmem:[%s949_s1] sm:$0xff]   ;;  %v797_v2 = vld [vmem:[%s951_s3 + $0x38] sm:$0xff]   ;;  %s957_s28 = smov (!%p271_p3, %s686_s28), 7  ;;  %vm312_vm0 = vcmask 261120   ;;  %vm620_vm1 = vcmask 130048  }
   0xc   : > { %739 = vmatprep.subr.bf16.mxu0 %v795_v0  ;;  %v798_v3 = vld [vmem:[%s951_s3 + $0x30] sm:$0xff]   ;;  %747 = vmatprep.subr.bf16.mxu1 %v797_v2  ;;  %s687_s12 = sshll.u32 %s957_s28, 3  ;;  %v799_v4 = vld [vmem:[%s951_s3 + $0x28] sm:$0xff]   ;;  %v800_v10 = vld [vmem:[%s951_s3 + $0x20] sm:$0xff]  }
   0xd   : > { %740 = vmatpush3.bf16.msra.mxu0 %v795_v0  ;;  %748 = vmatpush3.bf16.msra.mxu1 %v797_v2  ;;  %s274_s15 = scalar_lea.vmem %s948_s0, %s687_s12  ;;  %v801_v12 = vld [vmem:[%s951_s3 + $0x18] sm:$0xff]   ;;  %v802_v13 = vld [vmem:[%s951_s3 + $0x10] sm:$0xff]   ;;  %v803_v14 = vld [vmem:[%s951_s3 + $0x8] sm:$0xff]   ;;  %s280_s9 = scalar_lea.vmem %s955_s7, %s687_s12 }
   0xe   : > { %741 = vmatprep.subr.bf16.mxu0 %v796_v1  ;;  %749 = vmatprep.subr.bf16.mxu1 %v798_v3  ;;  %v283_v5 = vld [vmem:[%s274_s15] sm:$0xff]  ;;  %v284_v6 = vld [vmem:[%s274_s15 + $0x8] sm:$0xff]  ;;  %v285_v7 = vld [vmem:[%s274_s15 + $0x10] sm:$0xff] }
   0xf   : > { %v287_v8 = vpack.c.bf16 %v284_v6, %v283_v5  ;;  %v286_v9 = vld [vmem:[%s274_s15 + $0x18] sm:$0xff]  ;;  %v804_v15 = vld [vmem:[%s951_s3] sm:$0xff]   ;;  %v806_v17 = vld [vmem:[%s953_s5 + $0x30] sm:$0xff]  }
  0x10   : > { %v288_v11 = vpack.c.bf16 %v286_v9, %v285_v7  ;;  %v805_v16 = vld [vmem:[%s953_s5 + $0x38] sm:$0xff]   ;;  %v807_v18 = vld [vmem:[%s953_s5 + $0x28] sm:$0xff]   ;;  %v808_v19 = vld [vmem:[%s953_s5 + $0x20] sm:$0xff]  }
  0x11   : > { %742 = vmatpush3.bf16.msra.mxu0 %v796_v1  ;;  %750 = vmatpush3.bf16.msra.mxu1 %v798_v3  ;;  %v809_v20 = vld [vmem:[%s953_s5 + $0x18] sm:$0xff]   ;;  %v690_v23 = vld [vmem:[%s950_s2] ss:$0 sm:$0xff]  ;;  %v810_v36 = vld [vmem:[%s953_s5 + $0x10] sm:$0xff]  }
  0x12   : > { %743 = vmatprep.mubr.msk.bf16.mxu0 %vm312_vm0, %v287_v8  ;;  %751 = vmatprep.subr.bf16.mxu1 %v799_v4  ;;  %v811_v37 = vld [vmem:[%s953_s5 + $0x8] sm:$0xff]   ;;  %v812_v38 = vld [vmem:[%s953_s5] sm:$0xff]  }
  0x13   : > { %767 = vmatprep.subr.bf16.mxu0 %v805_v16  ;;  %v695_v41 = vld [vmem:[%s952_s4] ss:$0 sm:$0xff] }
  0x14   : > { %744 = vmatmul.mubr.msk.bf16.vlgmr.msra.gmra.mxu0 %vm312_vm0, %v288_v11  ;;  %v704_v55 = vld [vmem:[%s954_s6] ss:$0 sm:$0xff] }
  0x15   : > { %752 = vmatpush3.bf16.msra.mxu1 %v799_v4  ;;  %768 = vmatpush3.bf16.msra.mxu0 %v805_v16 }
  0x16   : > { %753 = vmatprep.subr.bf16.mxu1 %v800_v10  ;;  %769 = vmatprep.subr.bf16.mxu0 %v806_v17 }
  0x19   : > { %754 = vmatpush3.bf16.msra.mxu1 %v800_v10  ;;  %770 = vmatpush3.bf16.msra.mxu0 %v806_v17 }
  0x1a   : > { %755 = vmatprep.subr.bf16.mxu1 %v801_v12  ;;  %771 = vmatprep.subr.bf16.mxu0 %v807_v18 }
  0x1d   : > { %756 = vmatpush3.bf16.msra.mxu1 %v801_v12  ;;  %772 = vmatpush3.bf16.msra.mxu0 %v807_v18 }
  0x1e   : > { %757 = vmatprep.subr.bf16.mxu1 %v802_v13  ;;  %773 = vmatprep.subr.bf16.mxu0 %v808_v19 }
  0x21   : > { %758 = vmatpush3.bf16.msra.mxu1 %v802_v13  ;;  %774 = vmatpush3.bf16.msra.mxu0 %v808_v19 }
  0x22   : > { %759 = vmatprep.subr.bf16.mxu1 %v803_v14  ;;  %775 = vmatprep.subr.bf16.mxu0 %v809_v20 }
  0x25   : > { %760 = vmatpush3.bf16.msra.mxu1 %v803_v14  ;;  %776 = vmatpush3.bf16.msra.mxu0 %v809_v20 }
  0x26   : > { %761 = vmatprep.subr.bf16.mxu1 %v804_v15  ;;  %777 = vmatprep.subr.bf16.mxu0 %v810_v36 }
  0x29   : > { %762 = vmatpush3.bf16.msra.mxu1 %v804_v15  ;;  %778 = vmatpush3.bf16.msra.mxu0 %v810_v36 }
  0x2a   : > { %779 = vmatprep.subr.bf16.mxu0 %v811_v37 }
  0x2d   : > { %780 = vmatpush3.bf16.msra.mxu0 %v811_v37 }
  0x2e   : > { %781 = vmatprep.subr.bf16.mxu0 %v812_v38 }
  0x31   : > { %782 = vmatpush3.bf16.msra.mxu0 %v812_v38 }
  0xd4   : > { %v745_v21 = vpop.f32.mrf.mxu0 }
  0xd5   : > { %v362_v27 = vadd.f32 %v745_v21, %v690_v23 }
  0xd6   : > { %v353_v22 = vpop.f32.mrf.mxu0 }
  0xd7   : > { %v354_v25 = vadd.f32 %v690_v23, %v353_v22  ;;  %v370_v33 = vmax.f32 %v362_v27, 0.0 }
  0xd8   : > { %v746_v24 = vpop.f32.mrf.mxu0 }
  0xd9   : > { %v365_v26 = vadd.f32 %v746_v24, %v690_v23  ;;  %v368_v31 = vmax.f32 %v354_v25, 0.0 }
  0xda   : > { %v356_v28 = vpop.f32.mrf.mxu0 }
  0xdb   : > { %v357_v29 = vadd.f32 %v690_v23, %v356_v28  ;;  %v371_v30 = vmax.f32 %v365_v26, 0.0 }
  0xdd   : > { %v369_v32 = vmax.f32 %v357_v29, 0.0  ;;  %v373_v35 = vpack.c.bf16 %v371_v30, %v370_v33 }
  0xdf   : > { %v372_v34 = vpack.c.bf16 %v369_v32, %v368_v31 }
  0xe1   : > { %763 = vmatprep.mubr.bf16.mxu1 %v372_v34 }
  0xe2   : > { %764 = vmatmul.mubr.bf16.vlgmr.msra.gmra.mxu1 %v373_v35 }
 0x1a2   : > { %v765_v39 = vpop.f32.mrf.mxu1 }
 0x1a3   : > { %v488_v45 = vadd.f32 %v765_v39, %v695_v41 }
 0x1a4   : > { %v479_v40 = vpop.f32.mrf.mxu1 }
 0x1a5   : > { %v480_v43 = vadd.f32 %v695_v41, %v479_v40  ;;  %v496_v51 = vmax.f32 %v488_v45, 0.0 }
 0x1a6   : > { %v766_v42 = vpop.f32.mrf.mxu1 }
 0x1a7   : > { %v491_v44 = vadd.f32 %v766_v42, %v695_v41  ;;  %v494_v49 = vmax.f32 %v480_v43, 0.0 }
 0x1a8   : > { %v482_v46 = vpop.f32.mrf.mxu1 }
 0x1a9   : > { %v483_v47 = vadd.f32 %v695_v41, %v482_v46  ;;  %v497_v48 = vmax.f32 %v491_v44, 0.0 }
 0x1ab   : > { %v495_v50 = vmax.f32 %v483_v47, 0.0  ;;  %v499_v53 = vpack.c.bf16 %v497_v48, %v496_v51 }
 0x1ad   : > { %v498_v52 = vpack.c.bf16 %v495_v50, %v494_v49 }
 0x1af   : > { %783 = vmatprep.mubr.bf16.mxu0 %v498_v52 }
 0x1b0   : > { %784 = vmatmul.mubr.bf16.vlgmr.msra.gmra.mxu0 %v499_v53 }
 0x270   : > { %v785_v54 = vpop.f32.mrf.mxu0 }
 0x271   : > { %v614_v61 = vadd.f32 %v785_v54, %v704_v55 }
 0x272   : > { %v605_v56 = vpop.f32.mrf.mxu0 }
 0x273   : > { %v606_v57 = vadd.f32 %v704_v55, %v605_v56  ;;  %623 = vst.msk [vmem:[%s280_s9 + $0x10] sm:$0xff] %vm620_vm1, %v614_v61 }
 0x274   : > { %v786_v58 = vpop.f32.mrf.mxu0 }
 0x275   : > { %621 = vst.msk [vmem:[%s280_s9] sm:$0xff] %vm620_vm1, %v606_v57  ;;  %v617_v62 = vadd.f32 %v786_v58, %v704_v55 }
 0x276   : > { %v608_v59 = vpop.f32.mrf.mxu0 }
 0x277   : > { %v609_v60 = vadd.f32 %v704_v55, %v608_v59  ;;  %624 = vst.msk [vmem:[%s280_s9 + $0x18] sm:$0xff] %vm620_vm1, %v617_v62 }
 0x279   : > { %622 = vst.msk [vmem:[%s280_s9 + $0x8] sm:$0xff] %vm620_vm1, %v609_v60 }
 0x27a PF: > { %s17_s24 = sadd.s32 1, %s819_s24  }
 0x27b   : > { %p14_p4 = scmp.ge.s32.totalorder %s17_s24, 4  }
 0x27d   :  { %16 = sbr.rel (!%p14_p4) target bundleno = 1 (0x1), region = 78 }

</bundles_post_ra>
